<compile_context>
chip_gen: v7x
topology: tpu7x:2x2x1
jax: 0.10.0
libtpu: 0.0.40
codegen_flags: <defaults>
</compile_context>

<pallas_src>
import functools
from typing import NamedTuple

import jax
import jax.numpy as jnp
from jax import lax
from jax.experimental import pallas as pl
from jax.experimental.pallas import tpu as pltpu


def _round_up(x, m):
    return -(-x // m) * m


def _vmem_capacity_bytes():
    """Best-effort VMEM capacity query; conservative (v7x) fallback."""
    try:
        info = pltpu.get_tpu_info()
        for name in ("vmem_capacity_bytes", "vmem_size_bytes", "vmem_bytes"):
            cap = getattr(info, name, None)
            if cap:
                return int(cap)
    except Exception:
        pass
    return 64 << 20  # v7x per-TensorCore capacity (safe lower bound)


class DPSHPlan(NamedTuple):
    train_size: int
    padded_train: int
    n_split: int
    t_tile: int
    tiles_per_split: int
    vmem_limit_bytes: int


def make_dpsh_plan(train_size, n_classes, bit, batch, *, n_split=1,
                   max_t_tile=16384):
    """Static tiling plan (computed once at state-init time, NOT per call)."""
    vmem_cap = _vmem_capacity_bytes()
    cap = int(vmem_cap * 0.75)                      # ~48 MiB v7x / ~96 MiB v5e,v6e
    resident = 2 * batch * 2 * (bit + n_classes)    # double-buffered bf16 u, y
    budget = max(cap - (8 << 20) - resident, 4 << 20)
    # bytes per streamed train-size column:
    #   double-buffered bf16 U^T + Y^T tiles, plus the f32 accumulator row.
    per_col = 2 * 2 * (bit + n_classes) + batch * 4
    t_budget = budget // per_col

    per_split_cols = -(-train_size // n_split)
    t_tile = min(max_t_tile, t_budget, _round_up(per_split_cols, 128))
    t_tile = max(128, (t_tile // 128) * 128)
    tiles_per_split = -(-per_split_cols // t_tile)
    padded_train = n_split * tiles_per_split * t_tile

    need = 2 * t_tile * 2 * (bit + n_classes)       # double-buffered bf16 tiles
    need += resident                                # resident u / y blocks
    need += batch * t_tile * 4                      # f32 accumulator scratch
    vmem_limit = int(max(min(need + (8 << 20), cap), 16 << 20))

    return DPSHPlan(train_size, padded_train, n_split, t_tile,
                    tiles_per_split, vmem_limit)


def pack_dpsh_state(U, Y, plan):
    """Init-time only: (T,bit)/(T,nc) -> pre-padded, pre-transposed bf16 state."""
    pad = plan.padded_train - U.shape[0]
    U_T = jnp.pad(jnp.asarray(U, jnp.bfloat16).T, ((0, 0), (0, pad)))
    Y_T = jnp.pad(jnp.asarray(Y, jnp.bfloat16).T, ((0, 0), (0, pad)))
    return U_T, Y_T


def init_dpsh_state(plan, n_classes, bit):
    """Zero-initialized state, matching DPSHLoss.__init__ (padded/transposed)."""
    return (jnp.zeros((bit, plan.padded_train), jnp.bfloat16),
            jnp.zeros((n_classes, plan.padded_train), jnp.bfloat16))


def dpsh_kernel(u_ref, y_ref, ut_ref, yt_ref, out_ref, acc_ref, *,
                tiles_per_split):
    """Accumulate the likelihood loss over train-size tiles for one split."""
    j = pl.program_id(1)

    @pl.when(j == 0)
    def _():
        acc_ref[...] = jnp.zeros_like(acc_ref)

    # s = (y @ Y^T > 0)  -- bf16 operands, f32 MXU accumulation (exact for
    # {0,1} multi-hot labels); kept boolean, folded into a select below.
    s = jnp.dot(y_ref[...], yt_ref[...],
                preferred_element_type=jnp.float32) > 0.0
    # inner_product = (0.5 * u) @ U^T   (the 0.5 is pre-folded into u_ref)
    ip = jnp.dot(u_ref[...], ut_ref[...],
                 preferred_element_type=jnp.float32)
    # log(1 + exp(-|ip|)) + max(ip, 0) - s * ip
    # TODO(synk): on v6e/v7x, if EUP binds after the VALU trims, compute the
    #             exp/log1p pair in bf16 and accumulate in f32.
    ll = (jnp.log1p(jnp.exp(-jnp.abs(ip)))
          + jnp.maximum(ip, 0.0)
          - jnp.where(s, ip, 0.0))

    # Pure VPU elementwise accumulate; the single cross-lane reduction only
    # happens in the per-split epilogue.
    acc_ref[...] += ll

    @pl.when(j == tiles_per_split - 1)
    def _():
        out_ref[0, 0] = jnp.sum(acc_ref[...])


@functools.partial(jax.jit, static_argnames=("plan",), donate_argnums=(4, 5))
def dpsh_loss(u, y, ind, eta, U_T, Y_T, *, plan):
    """Functional equivalent of DPSHLoss.forward.

    u   : (B, bit)              f32 batch hash codes
    y   : (B, nc)               {0,1} multi-hot batch labels
    ind : (B,)                  int indices into the persistent buffers
    eta : scalar                quantization weight
    U_T : (bit, padded_T) bf16  persistent code buffer (donated, pre-padded)
    Y_T : (nc,  padded_T) bf16  persistent label buffer (donated, pre-padded)

    Returns (loss, U_T_new, Y_T_new) so the caller threads the state.
    """
    u = u.astype(jnp.float32)
    u_bf16 = u.astype(jnp.bfloat16)
    y_bf16 = y.astype(jnp.bfloat16)

    # State update self.U[ind]=u / self.Y[ind]=y: column scatter on donated,
    # pre-transposed, pre-padded buffers -> no pad / transpose on the hot path.
    U_T = U_T.astype(jnp.bfloat16).at[:, ind].set(u_bf16.T)
    Y_T = Y_T.astype(jnp.bfloat16).at[:, ind].set(y_bf16.T)

    batch, bit = u.shape
    n_classes = y.shape[1]
    t_tile = plan.t_tile
    tiles_per_split = plan.tiles_per_split
    n_split = plan.n_split
    assert U_T.shape == (bit, plan.padded_train)
    assert Y_T.shape == (n_classes, plan.padded_train)

    # "* 0.5" folded into the small batch-side operand (exact pow-2 scale).
    u_half = (u * 0.5).astype(jnp.bfloat16)

    kernel = functools.partial(dpsh_kernel, tiles_per_split=tiles_per_split)

    partials = pl.pallas_call(
        kernel,
        out_shape=jax.ShapeDtypeStruct((n_split, 1), jnp.float32),
        grid_spec=pltpu.PrefetchScalarGridSpec(
            num_scalar_prefetch=0,
            grid=(n_split, tiles_per_split),
            in_specs=[
                pl.BlockSpec((batch, bit), lambda c, j: (0, 0)),        # 0.5*u
                pl.BlockSpec((batch, n_classes), lambda c, j: (0, 0)),  # y
                pl.BlockSpec((bit, t_tile),
                             lambda c, j: (0, c * tiles_per_split + j)),  # U^T
                pl.BlockSpec((n_classes, t_tile),
                             lambda c, j: (0, c * tiles_per_split + j)),  # Y^T
            ],
            out_specs=pl.BlockSpec((1, 1), lambda c, j: (c, 0),
                                   memory_space=pltpu.SMEM),
            scratch_shapes=[pltpu.VMEM((batch, t_tile), jnp.float32)],
        ),
        compiler_params=pltpu.CompilerParams(
            dimension_semantics=("parallel", "arbitrary"),
            vmem_limit_bytes=plan.vmem_limit_bytes),
    )(u_half, y_bf16, U_T, Y_T)

    # Padded columns are all-zero: each contributes exactly log1p(exp(0)).
    pad = plan.padded_train - plan.train_size
    ll_sum = jnp.sum(partials)
    if pad:
        ll_sum = ll_sum - jnp.float32(batch * pad) * jnp.log1p(jnp.float32(1.0))
    likelihood = ll_sum / jnp.float32(batch * plan.train_size)

    # Quantization term hoisted out of the kernel (O(batch*bit), XLA-fused).
    quantization = eta * jnp.mean((u - jnp.sign(u)) ** 2)
    return likelihood + quantization, U_T, Y_T


if __name__ == "__main__":
    def run_case(seed, batch, bit, n_classes, train_size, eta, n_split=1):
        key = jax.random.PRNGKey(seed)
        k1, k2, k3, k4, k5 = jax.random.split(key, 5)

        u = jax.random.normal(k1, (batch, bit), jnp.float32)
        y = (jax.random.uniform(k2, (batch, n_classes)) > 0.7).astype(jnp.float32)
        ind = jax.random.permutation(k3, train_size)[:batch]

        # Simulated partially-filled training state (module buffers U, Y).
        U0 = jax.random.normal(k4, (train_size, bit), jnp.float32)
        Y0 = (jax.random.uniform(k5, (train_size, n_classes)) > 0.7).astype(jnp.float32)

        # Pure-JAX reference mirroring the PyTorch forward in full f32.
        U_ref = U0.at[ind, :].set(u)
        Y_ref = Y0.at[ind, :].set(y)
        s = (y @ Y_ref.T > 0).astype(jnp.float32)
        ip = jnp.dot(u, U_ref.T, precision=lax.Precision.HIGHEST) * 0.5
        ll = jnp.log1p(jnp.exp(-jnp.abs(ip))) + jnp.maximum(ip, 0.0) - s * ip
        ref = ll.mean() + eta * jnp.mean((u - jnp.sign(u)) ** 2)

        # Kernel path: plan + padded/transposed bf16 state built once at init.
        plan = make_dpsh_plan(train_size, n_classes, bit, batch, n_split=n_split)
        U_T0, Y_T0 = pack_dpsh_state(U0, Y0, plan)

        loss, _, _ = dpsh_loss(u, y, ind, eta, U_T0, Y_T0, plan=plan)
        loss = jax.block_until_ready(loss)
        # Tolerance accounts for bf16 storage/streaming of the hash codes.
        assert jnp.allclose(loss, ref, rtol=2e-3, atol=2e-3), (float(loss), float(ref))

    # Small lane-aligned case (no padding -> no log(2) correction).
    run_case(0, batch=8, bit=32, n_classes=16, train_size=256, eta=0.1)
    # Non-multiple train_size: exercises the wrapper-side log(2) correction.
    run_case(1, batch=8, bit=32, n_classes=16, train_size=300, eta=0.1)
    print("KERNEL_OK")
</pallas_src>

<mosaic_0001>
module attributes {stable_mosaic.version = 11 : i64} {
  func.func @dpsh_kernel(%arg0: i32, %arg1: i32, %arg2: memref<8x32xbf16, #tpu.memory_space<vmem>>, %arg3: memref<8x16xbf16, #tpu.memory_space<vmem>>, %arg4: memref<32x256xbf16, #tpu.memory_space<vmem>>, %arg5: memref<16x256xbf16, #tpu.memory_space<vmem>>, %arg6: memref<1x1xf32, #tpu.memory_space<smem>>, %arg7: memref<8x256xf32, #tpu.memory_space<vmem>>) attributes {dimension_semantics = [#tpu.dimension_semantics<parallel>, #tpu.dimension_semantics<arbitrary>], iteration_bounds = array<i64: 1, 1>, scalar_prefetch = 0 : i64, scratch_operands = 1 : i64, tpu.core_type = #tpu.core_type<tc>, window_params = [{pipeline_mode = #tpu.pipeline_mode<synchronous>, transform_indices = @transform_0, window_bounds = array<i64: 8, 32>}, {pipeline_mode = #tpu.pipeline_mode<synchronous>, transform_indices = @transform_1, window_bounds = array<i64: 8, 16>}, {transform_indices = @transform_2, window_bounds = array<i64: 32, 256>}, {transform_indices = @transform_3, window_bounds = array<i64: 16, 256>}, {transform_indices = @transform_4, window_bounds = array<i64: 1, 1>}]} {
    %c0_i32 = arith.constant 0 : i32
    %0 = arith.cmpi eq, %arg1, %c0_i32 : i32
    %1 = arith.extui %0 : i1 to i32
    %c0_i32_0 = arith.constant 0 : i32
    %2 = arith.cmpi ne, %1, %c0_i32_0 : i32
    scf.if %2 {
      %cst_19 = arith.constant 0.000000e+00 : f32
      %28 = vector.broadcast %cst_19 : f32 to vector<8x256xf32>
      %c0_20 = arith.constant 0 : index
      %c0_21 = arith.constant 0 : index
      %29 = vector.load %arg7[%c0_20, %c0_21] : memref<8x256xf32, #tpu.memory_space<vmem>>, vector<8x256xf32>
      tpu.vector_store %arg7[%c0_20, %c0_21], %28 {strides = array<i32>} : memref<8x256xf32, #tpu.memory_space<vmem>>, vector<8x256xf32>,
    } else {
    }
    %c0 = arith.constant 0 : index
    %c0_1 = arith.constant 0 : index
    %3 = vector.load %arg3[%c0, %c0_1] : memref<8x16xbf16, #tpu.memory_space<vmem>>, vector<8x16xbf16>
    %c0_2 = arith.constant 0 : index
    %c0_3 = arith.constant 0 : index
    %4 = vector.load %arg5[%c0_2, %c0_3] : memref<16x256xbf16, #tpu.memory_space<vmem>>, vector<16x256xbf16>
    %cst = arith.constant dense<0.000000e+00> : vector<8x256xf32>
    %5 = tpu.matmul %3, %4, %cst {dimension_numbers = #tpu.dot_dimension_numbers<[1], [0], [0], [1], [0, 0, 1, 1], [], []>} : vector<8x16xbf16>, vector<16x256xbf16>, vector<8x256xf32> -> vector<8x256xf32>
    %cst_4 = arith.constant 0.000000e+00 : f32
    %6 = vector.broadcast %cst_4 : f32 to vector<8x256xf32>
    %7 = arith.cmpf ogt, %5, %6 : vector<8x256xf32>
    %c0_5 = arith.constant 0 : index
    %c0_6 = arith.constant 0 : index
    %8 = vector.load %arg2[%c0_5, %c0_6] : memref<8x32xbf16, #tpu.memory_space<vmem>>, vector<8x32xbf16>
    %c0_7 = arith.constant 0 : index
    %c0_8 = arith.constant 0 : index
    %9 = vector.load %arg4[%c0_7, %c0_8] : memref<32x256xbf16, #tpu.memory_space<vmem>>, vector<32x256xbf16>
    %cst_9 = arith.constant dense<0.000000e+00> : vector<8x256xf32>
    %10 = tpu.matmul %8, %9, %cst_9 {dimension_numbers = #tpu.dot_dimension_numbers<[1], [0], [0], [1], [0, 0, 1, 1], [], []>} : vector<8x32xbf16>, vector<32x256xbf16>, vector<8x256xf32> -> vector<8x256xf32>
    %11 = math.absf %10 : vector<8x256xf32>
    %cst_10 = arith.constant 0.000000e+00 : f32
    %12 = vector.broadcast %cst_10 : f32 to vector<8x256xf32>
    %13 = arith.subf %12, %11 : vector<8x256xf32>
    %14 = math.exp %13 : vector<8x256xf32>
    %15 = math.log1p %14 : vector<8x256xf32>
    %cst_11 = arith.constant 0.000000e+00 : f32
    %16 = vector.broadcast %cst_11 : f32 to vector<8x256xf32>
    %17 = arith.maximumf %10, %16 : vector<8x256xf32>
    %18 = arith.addf %15, %17 : vector<8x256xf32>
    %cst_12 = arith.constant 0.000000e+00 : f32
    %19 = vector.broadcast %cst_12 : f32 to vector<8x256xf32>
    %20 = arith.select %7, %10, %19 : vector<8x256xi1>, vector<8x256xf32>
    %21 = arith.subf %18, %20 : vector<8x256xf32>
    %c0_13 = arith.constant 0 : index
    %c0_14 = arith.constant 0 : index
    %22 = vector.load %arg7[%c0_13, %c0_14] : memref<8x256xf32, #tpu.memory_space<vmem>>, vector<8x256xf32>
    %23 = arith.addf %22, %21 : vector<8x256xf32>
    %c0_15 = arith.constant 0 : index
    %c0_16 = arith.constant 0 : index
    %24 = vector.load %arg7[%c0_15, %c0_16] : memref<8x256xf32, #tpu.memory_space<vmem>>, vector<8x256xf32>
    tpu.vector_store %arg7[%c0_15, %c0_16], %23 {strides = array<i32>} : memref<8x256xf32, #tpu.memory_space<vmem>>, vector<8x256xf32>,
    %c0_i32_17 = arith.constant 0 : i32
    %25 = arith.cmpi eq, %arg1, %c0_i32_17 : i32
    %26 = arith.extui %25 : i1 to i32
    %c0_i32_18 = arith.constant 0 : i32
    %27 = arith.cmpi ne, %26, %c0_i32_18 : i32
    scf.if %27 {
      %c0_19 = arith.constant 0 : index
      %c0_20 = arith.constant 0 : index
      %28 = vector.load %arg7[%c0_19, %c0_20] : memref<8x256xf32, #tpu.memory_space<vmem>>, vector<8x256xf32>
      %29 = vector.shape_cast %28 : vector<8x256xf32> to vector<1x8x256xf32>
      %cst_21 = arith.constant dense<0.000000e+00> : vector<1xf32>
      %30 = vector.multi_reduction <add>, %29, %cst_21 [1, 2] : vector<1x8x256xf32> to vector<1xf32>
      %31 = vector.shape_cast %30 : vector<1xf32> to vector<1x1x1xf32>
      %32 = vector.extract %31[0, 0, 0] : f32 from vector<1x1x1xf32>
      %c0_22 = arith.constant 0 : index
      %c0_23 = arith.constant 0 : index
      %33 = memref.load %arg6[%c0_22, %c0_23] : memref<1x1xf32, #tpu.memory_space<smem>>
      memref.store %32, %arg6[%c0_22, %c0_23] : memref<1x1xf32, #tpu.memory_space<smem>>
    } else {
    }
    return
  }
  func.func @transform_0(%arg0: i32, %arg1: i32) -> (i32, i32) {
    %c0_i32 = arith.constant 0 : i32
    %c0_i32_0 = arith.constant 0 : i32
    %c0_i32_1 = arith.constant 0 : i32
    return %c0_i32, %c0_i32_0 : i32, i32
  }
  func.func @transform_1(%arg0: i32, %arg1: i32) -> (i32, i32) {
    %c0_i32 = arith.constant 0 : i32
    %c0_i32_0 = arith.constant 0 : i32
    %c0_i32_1 = arith.constant 0 : i32
    return %c0_i32, %c0_i32_0 : i32, i32
  }
  func.func @transform_2(%arg0: i32, %arg1: i32) -> (i32, i32) {
    %c1_i32 = arith.constant 1 : i32
    %0 = arith.muli %arg0, %c1_i32 : i32
    %1 = arith.addi %0, %arg1 : i32
    %c0_i32 = arith.constant 0 : i32
    %c0_i32_0 = arith.constant 0 : i32
    return %c0_i32, %1 : i32, i32
  }
  func.func @transform_3(%arg0: i32, %arg1: i32) -> (i32, i32) {
    %c1_i32 = arith.constant 1 : i32
    %0 = arith.muli %arg0, %c1_i32 : i32
    %1 = arith.addi %0, %arg1 : i32
    %c0_i32 = arith.constant 0 : i32
    %c0_i32_0 = arith.constant 0 : i32
    return %c0_i32, %1 : i32, i32
  }
  func.func @transform_4(%arg0: i32, %arg1: i32) -> (i32, i32) {
    %c0_i32 = arith.constant 0 : i32
    %c0_i32_0 = arith.constant 0 : i32
    return %arg0, %c0_i32 : i32, i32
  }
}

</mosaic_0001>

<bundles_post_ra>
// kernel: dpsh_loss.1
= control target key start
LH: loop header
LB: loop body
LE: loop exit
PB: predicated region body
PF: predicated region fallthrough
CT: control target
= control target key end

     0   :  { %v322_v2 = vmov 0   ;;  %s385_s0 = inlined_call_operand.vmem [shape: bf16[8,32], index: 0, kind: input, shape index: {}]   ;;  %s386_s1 = inlined_call_operand.vmem [shape: bf16[8,16], index: 1, kind: input, shape index: {}]   ;;  %s387_s2 = inlined_call_operand.vmem [shape: bf16[32,256], index: 2, kind: input, shape index: {}]   ;;  %s388_s3 = inlined_call_operand.vmem [shape: bf16[16,256], index: 3, kind: input, shape index: {}]   ;;  %s389_s4 = inlined_call_operand.hbm [shape: f32[1,1], index: 4, kind: output, shape index: {}]  }
   0x1   :  { %v293_v0 = vld [vmem:[%s387_s2 + $0x4] ss:$8 sps:$4 sm:$0xff]   ;;  %v295_v1 = vld [vmem:[%s387_s2] ss:$8 sps:$4 sm:$0xff]   ;;  %118 = vmatprep.mubr.bf16.mxu0 %v322_v2  ;;  %190 = vmatprep.mubr.bf16.mxu1 %v322_v2  ;;  %v299_v5 = vld [vmem:[%s387_s2 + $0x14] ss:$8 sps:$4 sm:$0xff]  }
   0x2   :  { %158 = vmatprep.subr.bf16.mxu1 %v293_v0  ;;  %v296_v3 = vld [vmem:[%s388_s3 + $0x4] ss:$8 sps:$4 sm:$0xff]   ;;  %v298_v4 = vld [vmem:[%s388_s3] ss:$8 sps:$4 sm:$0xff]   ;;  %v301_v6 = vld [vmem:[%s387_s2 + $0x10] ss:$8 sps:$4 sm:$0xff]  }
   0x3   :  { %159 = vmatpush1.bf16.msra.mxu1 %v295_v1  ;;  %86 = vmatprep.subr.bf16.mxu0 %v296_v3 }
   0x4   :  { %9 = vsyncpa [#allocation4], 0  ;;  %87 = vmatpush1.bf16.msra.mxu0 %v298_v4  ;;  %160 = vmatprep.subr.bf16.mxu1 %v299_v5  ;;  %v69_v7 = vld [vmem:[%s386_s1] sm:$0xf]  ;;  %vm82_vm0 = vcmask 130048   ;;  %vm154_vm1 = vcmask 261120  }
   0x5   :  { %v129_v8 = vld [vmem:[%s385_s0] sm:$0xf]  ;;  %s310_s30 = scalar_lea.hbm %s389_s4, 16 }
   0x6   :  { %p311_p0 = scmp.ne.s32.totalorder %s389_s4, %s310_s30  ;;  %p314_p1 = scmp.lt.u32.totalorder %s310_s30, %s389_s4 }
   0x7   :  { %161 = vmatpush1.bf16.msra.mxu1 %v301_v6  ;;  %283 = vmatmul.mubr.msk.bf16.vlgmr.msra.gmra.mrb[0].mxu0 %vm82_vm0, %v69_v7 }
   0x8   :  { %p316_p2 = pnand %p314_p1, %p311_p0 }
   0xa   :  { %288 = vmatmul.mubr.msk.bf16.vlgmr.msra.gmra.mrb[0].mxu1 %vm154_vm1, %v129_v8 }
  0xda   :  { %v120_v9 = vpop.f32.mrb[0].mxu0 }
  0xdb   :  { %vm127_vm2 = vcmp.gt.f32.partialorder %v120_v9, 0.0  ;;  %v122_v10 = vpop.f32.mrb[1].mxu0 }
  0xdc   :  { %vm128_vm3 = vcmp.gt.f32.partialorder %v122_v10, 0.0  ;;  %v124_v12 = vpop.f32.mrb[2].mxu0 }
  0xdd   :  { %v192_v11 = vpop.f32.mrb[0].mxu1  ;;  %v125_v15 = vpop.f32.mrb[3].mxu0 }
  0xde   :  { %v199_v13 = vand.u32 2147483647, %v192_v11  ;;  %v194_v14 = vpop.f32.mrb[1].mxu1  ;;  %v229_v16 = vsel %vm127_vm2, %v192_v11, 0.0  ;;  %v225_v39 = vmax.f32 %v192_v11, 0.0 }
  0xdf   :  { %v200_v17 = vand.u32 2147483647, %v194_v14  ;;  %v196_v18 = vpop.f32.mrb[2].mxu1  ;;  %v230_v19 = vsel %vm128_vm3, %v194_v14, 0.0  ;;  %v226_v42 = vmax.f32 %v194_v14, 0.0 }
  0xe0   :  { %v201_v20 = vsub.f32 0.0, %v199_v13  ;;  %v197_v21 = vpop.f32.mrb[3].mxu1 }
  0xe1   :  { %v202_v22 = vsub.f32 0.0, %v200_v17 }
  0xe2   :  { %v203_v23 = vmul.f32 1.442695, %v201_v20 }
  0xe3   :  { %v205_v24 = vmul.f32 1.442695, %v202_v22 }
  0xe4   :  { %302 = vpow2.f32 %v203_v23 }
  0xe5   :  { %304 = vpow2.f32 %v205_v24 }
  0xee   :  { %v303_v25 = vpop.eup %302 }
  0xef   :  { %v305_v26 = vpop.eup %304  ;;  %v207_v27 = vadd.f32 1.0, %v303_v25  ;;  %v210_v29 = vmul.f32 -0.5, %v303_v25  ;;  %v213_v32 = vand.u32 2147483647, %v303_v25 }
  0xf0   :  { %v216_v28 = vadd.f32 1.0, %v305_v26  ;;  %v219_v30 = vmul.f32 -0.5, %v305_v26  ;;  %v222_v34 = vand.u32 2147483647, %v305_v26 }
  0xf1   :  { %306 = vlog2.f32 %v207_v27  ;;  %v211_v31 = vadd.f32 1.0, %v210_v29  ;;  %vm214_vm4 = vcmp.lt.f32.partialorder %v213_v32, 0.0004427343 }
  0xf2   :  { %308 = vlog2.f32 %v216_v28  ;;  %v220_v33 = vadd.f32 1.0, %v219_v30  ;;  %vm223_vm5 = vcmp.lt.f32.partialorder %v222_v34, 0.0004427343 }
  0xf3   :  { %v212_v38 = vmul.f32 %v303_v25, %v211_v31 }
  0xf4   :  { %v221_v41 = vmul.f32 %v305_v26, %v220_v33 }
  0xfb   :  { %v307_v35 = vpop.eup %306 }
  0xfc   :  { %v309_v36 = vpop.eup %308  ;;  %v209_v37 = vmul.f32 0.6931472, %v307_v35 }
  0xfd   :  { %v218_v40 = vmul.f32 0.6931472, %v309_v36 }
  0xfe   :  { %v215_v43 = vsel %vm214_vm4, %v212_v38, %v209_v37 }
  0xff   :  { %v224_v44 = vsel %vm223_vm5, %v221_v41, %v218_v40  ;;  %v227_v45 = vadd.f32 %v225_v39, %v215_v43 }
 0x100   :  { %v228_v46 = vadd.f32 %v226_v42, %v224_v44 }
 0x101   :  { %v231_v47 = vsub.f32 %v227_v45, %v229_v16 }
 0x102   :  { %v232_v48 = vsub.f32 %v228_v46, %v230_v19 }
 0x104   :  { %v244_v49 = vadd.f32 %v232_v48, %v231_v47 }
 0x106   :  { %245 = vadd.xlane.f32.xlu0 %v244_v49 }
 0x193   :  { %v246_v50 = vpop.xlane.xlu0 %245 }
 0x194   :  { %v247_v51 = vrot.slane %v246_v50, 4 }
 0x196   :  { %v248_v52 = vadd.f32 %v247_v51, %v246_v50 }
 0x198   :  { %v249_v53 = vrot.slane %v248_v52, 2 }
 0x19a   :  { %v250_v54 = vadd.f32 %v249_v53, %v248_v52 }
 0x19c   :  { %v251_v55 = vrot.slane %v250_v54, 1 }
 0x19e   :  { %v252_v56 = vadd.f32 %v251_v55, %v250_v54 }
 0x1a0   :  { %289 = vpush %v252_v56 }
 0x1d1   :  { %s290_s0 = spop %289 }
 0x1d2   :  { %255 = sst [smem:[#allocation3]] %s290_s0 }
 0x1d3   :  { %319 = shalt.err (!%p316_p2)
}
 0x1d4   :  { %s323_s9 = smov [#allocation3]  }
 0x1d5   :  { %263 = dma.smem_to_hbm %s323_s9, 16, %s389_s4, [#allocation4]  }
 0x1d6   :  { %320 = dma.done.wait [#allocation4], 16  }
 0x1d7   :  { %321 = vsyncadd [#allocation4], 4294967280 }
 0x1d8   :  { %267 = sfence }
 0x1d9   :  { %268 = vsyncpa [#allocation4], 1 }

</bundles_post_ra>
